<compile_context>
chip_gen: v6e
topology: v6e:2x2x1
jax: 0.10.0
libtpu: 0.0.40
codegen_flags: <defaults>
</compile_context>

<pallas_src>
import functools

import jax
import jax.numpy as jnp
from jax.experimental import pallas as pl
from jax.experimental.pallas import tpu as pltpu


def _cparams(semantics, block_bytes):
    # explicit scoped-VMEM budget: ~2x(per-step blocks) + headroom, clamped to a safe range
    limit = int(min(64 * 2 ** 20, max(32 * 2 ** 20, 2 * int(block_bytes) + (4 << 20))))
    return pltpu.CompilerParams(dimension_semantics=semantics, vmem_limit_bytes=limit)


def _row_tile(m, max_tile=128):
    """Row tile (multiple of 8 when possible) giving >=2 grid steps for megacore."""
    if m <= 8:
        return m
    return int(min(max_tile, max(8, (m // 2) // 8 * 8)))


# ---------------------------------------------------------------------------
# Kernel 1a: MSDeformAttn value projection (tiled along Lv, bf16 output)
# ---------------------------------------------------------------------------

def _value_proj_kernel(src_ref, wv_ref, bv_ref, val_ref):
    acc = jnp.dot(src_ref[0], wv_ref[...], preferred_element_type=jnp.float32)
    val_ref[0] = (acc + bv_ref[...]).astype(val_ref.dtype)


def value_projection(src, wv, bv, *, max_rows=1024):
    B, Lv, C = src.shape
    tlv = Lv if Lv <= max_rows else max_rows
    lt = pl.cdiv(Lv, tlv)
    blk = 2 * (tlv * C * 2) + C * C * 2 + C * 4
    return pl.pallas_call(
        _value_proj_kernel,
        out_shape=jax.ShapeDtypeStruct((B, Lv, C), jnp.bfloat16),
        grid=(B, lt),
        in_specs=[pl.BlockSpec((1, tlv, C), lambda b, j: (b, j, 0)),
                  pl.BlockSpec((C, C), lambda b, j: (0, 0)),
                  pl.BlockSpec((1, C), lambda b, j: (0, 0))],
        out_specs=pl.BlockSpec((1, tlv, C), lambda b, j: (b, j, 0)),
        compiler_params=_cparams(("parallel", "parallel"), blk),
    )(src.astype(jnp.bfloat16), wv.astype(jnp.bfloat16), bv.reshape(1, C))


# ---------------------------------------------------------------------------
# Kernel 1b: fused [Woff || Wattn] projection of the (pos-embedded) query
# ---------------------------------------------------------------------------

def _oa_proj_kernel(q_ref, woa_ref, boa_ref, oa_ref):
    oa_ref[0] = (jnp.dot(q_ref[0], woa_ref[...], preferred_element_type=jnp.float32)
                 + boa_ref[...]).astype(oa_ref.dtype)


def offsets_attn_projection(query, p):
    B, NQ, C = query.shape
    # trace-time weight rearrangement (constant-folded under jit)
    woa = jnp.concatenate([p["Woff"], p["Wattn"]], axis=1).astype(jnp.bfloat16)
    boa = jnp.concatenate([p["boff"], p["battn"]], axis=0).reshape(1, -1)
    D = woa.shape[1]
    blk = NQ * C * 2 + C * D * 2 + D * 4 + NQ * D * 4
    # TODO(synk): at production NQ (~300) add a second parallel grid axis over NQ tiles.
    return pl.pallas_call(
        _oa_proj_kernel,
        out_shape=jax.ShapeDtypeStruct((B, NQ, D), jnp.float32),
        grid=(B,),
        in_specs=[pl.BlockSpec((1, NQ, C), lambda b: (b, 0, 0)),
                  pl.BlockSpec((C, D), lambda b: (0, 0)),
                  pl.BlockSpec((1, D), lambda b: (0, 0))],
        out_specs=pl.BlockSpec((1, NQ, D), lambda b: (b, 0, 0)),
        compiler_params=_cparams(("parallel",), blk),
    )(query.astype(jnp.bfloat16), woa, boa)


# ---------------------------------------------------------------------------
# Kernel 2: fused token tail
#   (L*P) reduce of attn-weighted samples (VPU) + Wout + residual + norm1
#   + linear1/ReLU/linear2 + residual + norm3, over flattened B*NQ row tiles
# ---------------------------------------------------------------------------

def _tail_kernel(prop_ref, samp_ref, wout_ref, bo_ref, g1_ref, be1_ref,
                 w1_ref, b1_ref, w2_ref, b2_ref, g3_ref, be3_ref, o_ref):
    x0 = prop_ref[...].astype(jnp.float32)                        # (TQ, C) residual
    # attention weights were pre-multiplied into samp (fused with the gather in XLA);
    # the (L*P) reduce here is cheap VPU filler under the MXU matmuls.
    lp = samp_ref.shape[1]
    comb = samp_ref[:, 0, :].astype(jnp.float32)
    for i in range(1, lp):
        comb = comb + samp_ref[:, i, :].astype(jnp.float32)       # (TQ, C)
    y = jnp.dot(comb.astype(jnp.bfloat16), wout_ref[...],
                preferred_element_type=jnp.float32) + bo_ref[...]
    z = x0 + y                                                    # dropout1 = identity (eval)
    mu = jnp.mean(z, axis=-1, keepdims=True)
    var = jnp.mean((z - mu) ** 2, axis=-1, keepdims=True)
    h0 = (z - mu) * jax.lax.rsqrt(var + 1e-5) * g1_ref[...] + be1_ref[...]   # norm1
    h = jnp.dot(h0.astype(jnp.bfloat16), w1_ref[...],
                preferred_element_type=jnp.float32) + b1_ref[...]
    h = jnp.maximum(h, 0.0)                                       # ReLUDropout, eval
    y2 = jnp.dot(h.astype(jnp.bfloat16), w2_ref[...],
                 preferred_element_type=jnp.float32) + b2_ref[...]
    z2 = h0 + y2                                                  # dropout4 = identity
    mu2 = jnp.mean(z2, axis=-1, keepdims=True)
    var2 = jnp.mean((z2 - mu2) ** 2, axis=-1, keepdims=True)
    o_ref[...] = ((z2 - mu2) * jax.lax.rsqrt(var2 + 1e-5) * g3_ref[...]
                  + be3_ref[...]).astype(o_ref.dtype)             # norm3


def deform_tail(proposals, samp_w, cross_p, norm1_p, ffn_p):
    B, NQ, C = proposals.shape
    LP = samp_w.shape[2]
    F = ffn_p["W1"].shape[1]
    M = B * NQ
    tq = _row_tile(M)
    blk = (tq * C * 4 + tq * LP * C * 2 + C * C * 2 + C * F * 2 + F * C * 2
           + 8 * max(C, F) * 4 + tq * C * 4)
    out = pl.pallas_call(
        _tail_kernel,
        out_shape=jax.ShapeDtypeStruct((M, C), jnp.float32),
        grid=(pl.cdiv(M, tq),),
        in_specs=[
            pl.BlockSpec((tq, C), lambda i: (i, 0)),
            pl.BlockSpec((tq, LP, C), lambda i: (i, 0, 0)),
            pl.BlockSpec((C, C), lambda i: (0, 0)),
            pl.BlockSpec((1, C), lambda i: (0, 0)),
            pl.BlockSpec((1, C), lambda i: (0, 0)),
            pl.BlockSpec((1, C), lambda i: (0, 0)),
            pl.BlockSpec((C, F), lambda i: (0, 0)),
            pl.BlockSpec((1, F), lambda i: (0, 0)),
            pl.BlockSpec((F, C), lambda i: (0, 0)),
            pl.BlockSpec((1, C), lambda i: (0, 0)),
            pl.BlockSpec((1, C), lambda i: (0, 0)),
            pl.BlockSpec((1, C), lambda i: (0, 0)),
        ],
        out_specs=pl.BlockSpec((tq, C), lambda i: (i, 0)),
        compiler_params=_cparams(("parallel",), blk),
    )(proposals.reshape(M, C), samp_w.reshape(M, LP, C),
      cross_p["Wout"].astype(jnp.bfloat16), cross_p["bout"].reshape(1, C),
      norm1_p["g"].reshape(1, C), norm1_p["b"].reshape(1, C),
      ffn_p["W1"].astype(jnp.bfloat16), ffn_p["b1"].reshape(1, F),
      ffn_p["W2"].astype(jnp.bfloat16), ffn_p["b2"].reshape(1, C),
      ffn_p["g"].reshape(1, C), ffn_p["b"].reshape(1, C))
    return out.reshape(B, NQ, C)


# FFN + norm3 only (used when num_proposals == 0, i.e. no cross-attn / norm1 branch)
def _ffn_ln_kernel(x_ref, w1_ref, b1_ref, w2_ref, b2_ref, g_ref, be_ref, o_ref):
    x = x_ref[...].astype(jnp.float32)
    h = jnp.maximum(jnp.dot(x.astype(jnp.bfloat16), w1_ref[...],
                            preferred_element_type=jnp.float32) + b1_ref[...], 0.0)
    y = jnp.dot(h.astype(jnp.bfloat16), w2_ref[...],
                preferred_element_type=jnp.float32) + b2_ref[...]
    z = x + y
    mu = jnp.mean(z, axis=-1, keepdims=True)
    var = jnp.mean((z - mu) ** 2, axis=-1, keepdims=True)
    o_ref[...] = ((z - mu) * jax.lax.rsqrt(var + 1e-5) * g_ref[...]
                  + be_ref[...]).astype(o_ref.dtype)


def ffn_layernorm(x, p):
    B, N, C = x.shape
    F = p["W1"].shape[1]
    M = B * N
    tq = _row_tile(M)
    blk = 2 * tq * C * 4 + C * F * 2 + F * C * 2 + 8 * max(C, F) * 4
    out = pl.pallas_call(
        _ffn_ln_kernel,
        out_shape=jax.ShapeDtypeStruct((M, C), jnp.float32),
        grid=(pl.cdiv(M, tq),),
        in_specs=[pl.BlockSpec((tq, C), lambda i: (i, 0)),
                  pl.BlockSpec((C, F), lambda i: (0, 0)),
                  pl.BlockSpec((1, F), lambda i: (0, 0)),
                  pl.BlockSpec((F, C), lambda i: (0, 0)),
                  pl.BlockSpec((1, C), lambda i: (0, 0)),
                  pl.BlockSpec((1, C), lambda i: (0, 0)),
                  pl.BlockSpec((1, C), lambda i: (0, 0))],
        out_specs=pl.BlockSpec((tq, C), lambda i: (i, 0)),
        compiler_params=_cparams(("parallel",), blk),
    )(x.reshape(M, C), p["W1"].astype(jnp.bfloat16), p["b1"].reshape(1, F),
      p["W2"].astype(jnp.bfloat16), p["b2"].reshape(1, C),
      p["g"].reshape(1, C), p["b"].reshape(1, C))
    return out.reshape(B, N, C)


# ---------------------------------------------------------------------------
# Kernel 3: fused WeightAttention (proposal->track and proposal->proposal)
#   lane-dense packed output slab (B, 4, NQ, Wpad), per-head weight blocks
# ---------------------------------------------------------------------------

# TODO(synk): WeightAttention source was not provided with the module; this keeps the
# previous cosine-sim + scaled-dot softmax formulation (2 heads, averaged over heads).
def _wattn_kernel(prop_ref, pkey_ref, tkey_ref, wq_ref, bq_ref, wk_ref, bk_ref,
                  out_ref, *, num_heads, head_dim, n_track, n_prop, scale):
    NQ = prop_ref.shape[1]
    W = pkey_ref.shape[1]
    p = prop_ref[0]             # (NQ, C) bf16 queries
    pk = pkey_ref[0]            # (W, C)  bf16 keys (proposals), zero-padded past n_prop
    tk = tkey_ref[0]            # (W, C)  bf16 keys (tracks),    zero-padded past n_track

    lane = jax.lax.broadcasted_iota(jnp.int32, (NQ, W), 1)
    valid_t = lane < n_track
    valid_p = lane < n_prop
    ones = jnp.ones((1, head_dim), jnp.float32)

    ptc = jnp.zeros((NQ, W), jnp.float32)
    ptm = jnp.zeros((NQ, W), jnp.float32)
    ppc = jnp.zeros((NQ, W), jnp.float32)
    ppm = jnp.zeros((NQ, W), jnp.float32)

    for h in range(num_heads):   # per-head weight blocks -> no in-kernel lane slicing
        qh = jnp.dot(p, wq_ref[h], preferred_element_type=jnp.float32) + bq_ref[h]
        kth = jnp.dot(tk, wk_ref[h], preferred_element_type=jnp.float32) + bk_ref[h]
        kph = jnp.dot(pk, wk_ref[h], preferred_element_type=jnp.float32) + bk_ref[h]
        q_bf = qh.astype(jnp.bfloat16)
        qn = jax.lax.rsqrt(jnp.sum(qh * qh, axis=-1, keepdims=True) + 1e-12)  # (NQ,1)

        def pair(kh, valid):
            # one QK^T matmul; cosine map by row/col rsqrt scaling (EUP, ~free)
            s = jax.lax.dot_general(q_bf, kh.astype(jnp.bfloat16),
                                    (((1,), (1,)), ((), ())),
                                    preferred_element_type=jnp.float32)       # (NQ, W)
            sc = jnp.where(valid, s * scale, -1e30)
            m = jnp.max(sc, axis=-1, keepdims=True)
            e = jnp.exp(sc - m)
            mm = e * pl.reciprocal(jnp.sum(e, axis=-1, keepdims=True), approx=True)
            kn2 = jax.lax.dot_general(ones, kh * kh, (((1,), (1,)), ((), ())),
                                      preferred_element_type=jnp.float32)     # (1, W)
            cos = jnp.where(valid, s * qn * jax.lax.rsqrt(kn2 + 1e-12), 0.0)
            return cos, mm

        c1, m1 = pair(kth, valid_t)
        c2, m2 = pair(kph, valid_p)
        ptc = ptc + c1
        ptm = ptm + m1
        ppc = ppc + c2
        ppm = ppm + m2

    inv = 1.0 / num_heads
    out_ref[0, 0] = ptc * inv     # (NQ, W) unmasked lane-dense stores
    out_ref[0, 1] = ptm * inv
    out_ref[0, 2] = ppc * inv
    out_ref[0, 3] = ppm * inv


def weight_attention_pair(proposals, track_queries, p, num_heads=2):
    B, NQ, C = proposals.shape
    NT = track_queries.shape[1]
    assert C % num_heads == 0
    Dh = C // num_heads
    scale = Dh ** -0.5
    W = max(128, ((max(NQ, NT) + 127) // 128) * 128)    # lane-dense output width

    # per-head weight blocks prepared at trace time (avoid in-kernel lane slicing)
    wq_h = p["Wq"].reshape(C, num_heads, Dh).transpose(1, 0, 2).astype(jnp.bfloat16)
    wk_h = p["Wk"].reshape(C, num_heads, Dh).transpose(1, 0, 2).astype(jnp.bfloat16)
    bq_h = p["bq"].reshape(num_heads, 1, Dh)
    bk_h = p["bk"].reshape(num_heads, 1, Dh)

    prop_b = proposals.astype(jnp.bfloat16)
    pad_p = jnp.zeros((B, W, C), jnp.bfloat16).at[:, :NQ].set(prop_b)
    pad_t = jnp.zeros((B, W, C), jnp.bfloat16).at[:, :NT].set(
        track_queries.astype(jnp.bfloat16))

    blk = (NQ * C * 2 + 2 * W * C * 2 + 2 * num_heads * C * Dh * 2
           + 2 * num_heads * Dh * 4 + 4 * NQ * W * 4)
    kern = functools.partial(_wattn_kernel, num_heads=num_heads, head_dim=Dh,
                             n_track=NT, n_prop=NQ, scale=scale)
    out = pl.pallas_call(
        kern,
        out_shape=jax.ShapeDtypeStruct((B, 4, NQ, W), jnp.float32),
        grid=(B,),
        in_specs=[
            pl.BlockSpec((1, NQ, C), lambda b: (b, 0, 0)),
            pl.BlockSpec((1, W, C), lambda b: (b, 0, 0)),
            pl.BlockSpec((1, W, C), lambda b: (b, 0, 0)),
            pl.BlockSpec((num_heads, C, Dh), lambda b: (0, 0, 0)),
            pl.BlockSpec((num_heads, 1, Dh), lambda b: (0, 0, 0)),
            pl.BlockSpec((num_heads, C, Dh), lambda b: (0, 0, 0)),
            pl.BlockSpec((num_heads, 1, Dh), lambda b: (0, 0, 0)),
        ],
        out_specs=pl.BlockSpec((1, 4, NQ, W), lambda b: (b, 0, 0, 0)),
        compiler_params=_cparams(("parallel",), blk),
    )(prop_b, pad_p, pad_t, wq_h, bq_h, wk_h, bk_h)

    pt_cos = out[:, 0, :, :NT]
    pt_mm = out[:, 1, :, :NT]
    pp_cos = out[:, 2, :, :NQ]
    pp_mm = out[:, 3, :, :NQ]
    return pt_cos, pt_mm, pp_cos, pp_mm


# ---------------------------------------------------------------------------
# MSDeformAttn glue: sampling locations + 4-corner bilinear gather (XLA)
# ---------------------------------------------------------------------------

def _gather_bilinear(v_l, x, y, Hl, Wl):
    """v_l: (B, S, H, Dh) bf16; x, y: (B, Lq, H, P) pixel coords.
    grid_sample semantics: bilinear, zero padding, align_corners=False."""
    B, S, H, Dh = v_l.shape
    Lq, P = x.shape[1], x.shape[3]
    x0 = jnp.floor(x)
    y0 = jnp.floor(y)
    fx = x - x0
    fy = y - y0

    def corner(xc, yc, w):
        valid = (xc >= 0) & (xc <= Wl - 1) & (yc >= 0) & (yc <= Hl - 1)
        xi = jnp.clip(xc, 0, Wl - 1).astype(jnp.int32)
        yi = jnp.clip(yc, 0, Hl - 1).astype(jnp.int32)
        idx = yi * Wl + xi                                             # (B, Lq, H, P)
        idx = jnp.transpose(idx, (0, 1, 3, 2)).reshape(B, Lq * P, H)   # (B, Lq*P, H)
        idx = jnp.broadcast_to(idx[..., None], (B, Lq * P, H, Dh))
        g = jnp.take_along_axis(v_l, idx, axis=1)                      # (B, Lq*P, H, Dh)
        g = g.reshape(B, Lq, P, H, Dh).transpose(0, 1, 3, 2, 4)        # (B, Lq, H, P, Dh)
        return g.astype(jnp.float32) * (w * valid.astype(jnp.float32))[..., None]

    return (corner(x0, y0, (1.0 - fx) * (1.0 - fy))
            + corner(x0 + 1.0, y0, fx * (1.0 - fy))
            + corner(x0, y0 + 1.0, (1.0 - fx) * fy)
            + corner(x0 + 1.0, y0 + 1.0, fx * fy))


def ms_deform_attn_fused(query, ref_pts, src, spatial_shapes, level_start_index,
                         proposals, cross_p, norm1_p, ffn_p,
                         n_heads, n_levels, n_points):
    """Fused: MSDeformAttn(query) -> + proposals -> norm1 -> FFN -> norm3."""
    B, Lq, C = query.shape
    Dh = C // n_heads
    off_dim = n_heads * n_levels * n_points * 2

    value = value_projection(src, cross_p["Wv"], cross_p["bv"])          # (B, Lv, C) bf16
    value = value.reshape(B, -1, n_heads, Dh)
    oa = offsets_attn_projection(query, cross_p)                         # (B, Lq, D) f32
    offsets = oa[..., :off_dim].reshape(B, Lq, n_heads, n_levels, n_points, 2)
    attn = oa[..., off_dim:].reshape(B, Lq, n_heads, n_levels * n_points)
    # TODO(synk): softmax over the tiny (n_levels*n_points) axis left to XLA.
    attn = jax.nn.softmax(attn, axis=-1).reshape(B, Lq, n_heads, n_levels, n_points)

    offset_normalizer = jnp.array([[w, h] for (h, w) in spatial_shapes], jnp.float32)
    loc = (ref_pts[:, :, None, :, None, :]
           + offsets / offset_normalizer[None, None, None, :, None, :])   # (B,Lq,H,L,P,2)

    # Bilinear sampling via 4-corner gathers (replaces the dense one-hot matmul).
    # TODO(synk): at production memory sizes (Hl*Wl >= 10k) turn this into a Pallas
    # kernel with scalar-prefetched corner indices / manual DMA gather fused with the
    # attention-weighted combine.
    levels = []
    for l, (Hl, Wl) in enumerate(spatial_shapes):
        start = level_start_index[l]
        S = Hl * Wl
        v_l = value[:, start:start + S]
        x = loc[:, :, :, l, :, 0] * Wl - 0.5
        y = loc[:, :, :, l, :, 1] * Hl - 0.5
        levels.append(_gather_bilinear(v_l, x, y, Hl, Wl))
    sampled = jnp.stack(levels, axis=3)                                   # (B,Lq,H,L,P,Dh)

    # Pre-multiply the attention weights (fused with the gather by XLA); the (L*P)
    # reduce and the ORIGINAL (C,C) Wout matmul happen inside the tail kernel.
    weighted = sampled * attn[..., None]
    samp_w = weighted.transpose(0, 1, 3, 4, 2, 5).reshape(
        B, Lq, n_levels * n_points, C).astype(jnp.bfloat16)               # heads concat last

    return deform_tail(proposals, samp_w, cross_p, norm1_p, ffn_p)


# ---------------------------------------------------------------------------
# SimDecoderLayer forward (self_cross=False -> cross-self path), eval mode
# ---------------------------------------------------------------------------

def sim_decoder_layer_forward(params, proposals, track_queries, p_query_pos, t_query_pos,
                              proposal_ref_pts, src, spatial_shapes, level_start_index,
                              num_proposals, n_heads, n_levels, n_points):
    if num_proposals != 0:
        q = proposals + p_query_pos                           # with_pos_embed
        # cross-attn + dropout1(identity) + norm1 + FFN + norm3, fused
        proposals = ms_deform_attn_fused(
            q, proposal_ref_pts, src, spatial_shapes, level_start_index, proposals,
            params["cross"], params["norm1"], params["ffn"], n_heads, n_levels, n_points)
    else:
        proposals = ffn_layernorm(proposals, params["ffn"])   # forward_ffn_proposal only
    pt_cos, pt_mm, pp_cos, pp_mm = weight_attention_pair(
        proposals, track_queries, params["wattn"])
    return proposals, pt_cos, pt_mm, pp_cos, pp_mm


# ---------------------------------------------------------------------------
# deterministic parameter init
# ---------------------------------------------------------------------------

def init_params(key, C, F, n_heads, n_levels, n_points):
    ks = jax.random.split(key, 12)

    def w(k, shape, scale=0.02):
        return jax.random.normal(k, shape, jnp.float32) * scale

    off_dim = n_heads * n_levels * n_points * 2
    attn_dim = n_heads * n_levels * n_points
    return {
        "cross": {
            "Wv": w(ks[0], (C, C)), "bv": jnp.zeros((C,), jnp.float32),
            "Woff": w(ks[1], (C, off_dim)), "boff": w(ks[2], (off_dim,), 1.0),
            "Wattn": w(ks[3], (C, attn_dim)), "battn": jnp.zeros((attn_dim,), jnp.float32),
            "Wout": w(ks[4], (C, C)), "bout": jnp.zeros((C,), jnp.float32),
        },
        "norm1": {"g": jnp.ones((C,), jnp.float32), "b": jnp.zeros((C,), jnp.float32)},
        "ffn": {
            "W1": w(ks[5], (C, F)), "b1": jnp.zeros((F,), jnp.float32),
            "W2": w(ks[6], (F, C)), "b2": jnp.zeros((C,), jnp.float32),
            "g": jnp.ones((C,), jnp.float32), "b": jnp.zeros((C,), jnp.float32),
        },
        "wattn": {
            "Wq": w(ks[7], (C, C)), "bq": jnp.zeros((C,), jnp.float32),
            "Wk": w(ks[8], (C, C)), "bk": jnp.zeros((C,), jnp.float32),
        },
    }


# ---------------------------------------------------------------------------

if __name__ == "__main__":
    # small synthetic shapes consistent with the module
    D_MODEL, D_FFN = 32, 64
    N_LEVELS, N_HEADS, N_POINTS = 2, 4, 2
    B, NQ, NT = 2, 8, 4
    SPATIAL_SHAPES = [(8, 8), (4, 4)]                 # (H_l, W_l) per level
    LEVEL_START = [0, 64]
    LV = sum(h * w for h, w in SPATIAL_SHAPES)        # 80

    key = jax.random.PRNGKey(0)
    kp, k1, k2, k3, k4, k5, k6 = jax.random.split(key, 7)
    params = init_params(kp, D_MODEL, D_FFN, N_HEADS, N_LEVELS, N_POINTS)

    proposals = jax.random.normal(k1, (B, NQ, D_MODEL), jnp.float32)
    track_queries = jax.random.normal(k2, (B, NT, D_MODEL), jnp.float32)
    p_query_pos = jax.random.normal(k3, (B, NQ, D_MODEL), jnp.float32)
    t_query_pos = jax.random.normal(k4, (B, NT, D_MODEL), jnp.float32)
    proposal_ref_pts = jax.random.uniform(k5, (B, NQ, N_LEVELS, 2), jnp.float32)
    src = jax.random.normal(k6, (B, LV, D_MODEL), jnp.float32)

    outs = sim_decoder_layer_forward(
        params, proposals, track_queries, p_query_pos, t_query_pos,
        proposal_ref_pts, src, SPATIAL_SHAPES, LEVEL_START,
        num_proposals=NQ, n_heads=N_HEADS, n_levels=N_LEVELS, n_points=N_POINTS)

    outs = jax.block_until_ready(outs)
    new_proposals, pt_cos, pt_mm, pp_cos, pp_mm = outs
    assert new_proposals.shape == (B, NQ, D_MODEL)
    assert pt_cos.shape == (B, NQ, NT) and pt_mm.shape == (B, NQ, NT)
    assert pp_cos.shape == (B, NQ, NQ) and pp_mm.shape == (B, NQ, NQ)
    assert all(bool(jnp.all(jnp.isfinite(o))) for o in outs)
    print("KERNEL_OK")
</pallas_src>

<mosaic_0001>
module attributes {stable_mosaic.version = 11 : i64} {
  func.func @_value_proj_kernel(%arg0: i32, %arg1: i32, %arg2: memref<1x80x32xbf16, #tpu.memory_space<vmem>>, %arg3: memref<32x32xbf16, #tpu.memory_space<vmem>>, %arg4: memref<1x32xf32, #tpu.memory_space<vmem>>, %arg5: memref<1x80x32xbf16, #tpu.memory_space<vmem>>) attributes {dimension_semantics = [#tpu.dimension_semantics<parallel>, #tpu.dimension_semantics<parallel>], iteration_bounds = array<i64: 2, 1>, scalar_prefetch = 0 : i64, scratch_operands = 0 : i64, tpu.core_type = #tpu.core_type<tc>, window_params = [{transform_indices = @transform_0, window_bounds = array<i64: 1, 80, 32>}, {pipeline_mode = #tpu.pipeline_mode<synchronous>, transform_indices = @transform_1, window_bounds = array<i64: 32, 32>}, {pipeline_mode = #tpu.pipeline_mode<synchronous>, transform_indices = @transform_2, window_bounds = array<i64: 1, 32>}, {transform_indices = @transform_3, window_bounds = array<i64: 1, 80, 32>}]} {
    %c0 = arith.constant 0 : index
    %c0_0 = arith.constant 0 : index
    %c0_1 = arith.constant 0 : index
    %0 = vector.load %arg2[%c0, %c0_0, %c0_1] : memref<1x80x32xbf16, #tpu.memory_space<vmem>>, vector<1x80x32xbf16>
    %1 = vector.shape_cast %0 : vector<1x80x32xbf16> to vector<80x32xbf16>
    %c0_2 = arith.constant 0 : index
    %c0_3 = arith.constant 0 : index
    %2 = vector.load %arg3[%c0_2, %c0_3] : memref<32x32xbf16, #tpu.memory_space<vmem>>, vector<32x32xbf16>
    %cst = arith.constant dense<0.000000e+00> : vector<80x32xf32>
    %3 = tpu.matmul %1, %2, %cst {dimension_numbers = #tpu.dot_dimension_numbers<[1], [0], [0], [1], [0, 0, 1, 1], [], []>} : vector<80x32xbf16>, vector<32x32xbf16>, vector<80x32xf32> -> vector<80x32xf32>
    %c0_4 = arith.constant 0 : index
    %c0_5 = arith.constant 0 : index
    %4 = vector.load %arg4[%c0_4, %c0_5] : memref<1x32xf32, #tpu.memory_space<vmem>>, vector<1x32xf32>
    %5 = vector.broadcast %4 : vector<1x32xf32> to vector<80x32xf32>
    %6 = arith.addf %3, %5 : vector<80x32xf32>
    %7 = arith.truncf %6 : vector<80x32xf32> to vector<80x32xbf16>
    %c0_6 = arith.constant 0 : index
    %c0_7 = arith.constant 0 : index
    %c0_8 = arith.constant 0 : index
    %8 = vector.load %arg5[%c0_6, %c0_7, %c0_8] : memref<1x80x32xbf16, #tpu.memory_space<vmem>>, vector<1x80x32xbf16>
    %9 = vector.shape_cast %8 : vector<1x80x32xbf16> to vector<80x32xbf16>
    %10 = vector.shape_cast %7 : vector<80x32xbf16> to vector<1x80x32xbf16>
    tpu.vector_store %arg5[%c0_6, %c0_7, %c0_8], %10 {strides = array<i32>} : memref<1x80x32xbf16, #tpu.memory_space<vmem>>, vector<1x80x32xbf16>,
    return
  }
  func.func @transform_0(%arg0: i32, %arg1: i32) -> (i32, i32, i32) {
    %c0_i32 = arith.constant 0 : i32
    %c0_i32_0 = arith.constant 0 : i32
    return %arg0, %arg1, %c0_i32 : i32, i32, i32
  }
  func.func @transform_1(%arg0: i32, %arg1: i32) -> (i32, i32) {
    %c0_i32 = arith.constant 0 : i32
    %c0_i32_0 = arith.constant 0 : i32
    %c0_i32_1 = arith.constant 0 : i32
    return %c0_i32, %c0_i32_0 : i32, i32
  }
  func.func @transform_2(%arg0: i32, %arg1: i32) -> (i32, i32) {
    %c0_i32 = arith.constant 0 : i32
    %c0_i32_0 = arith.constant 0 : i32
    %c0_i32_1 = arith.constant 0 : i32
    return %c0_i32, %c0_i32_0 : i32, i32
  }
  func.func @transform_3(%arg0: i32, %arg1: i32) -> (i32, i32, i32) {
    %c0_i32 = arith.constant 0 : i32
    %c0_i32_0 = arith.constant 0 : i32
    return %arg0, %arg1, %c0_i32 : i32, i32, i32
  }
}

</mosaic_0001>

<bundles_post_ra>
// kernel: tpu_custom_call.1
= control target key start
LH: loop header
LB: loop body
LE: loop exit
PB: predicated region body
PF: predicated region fallthrough
CT: control target
= control target key end

     0   :  { %s653_s12 = smov 0   ;;  %s655_s13 = smov 0   ;;  %s722_s0 = inlined_call_operand.vmem [shape: bf16[2,80,32], index: 0, kind: input, shape index: {}]   ;;  %s723_s1 = inlined_call_operand.vmem [shape: bf16[32,32], index: 1, kind: input, shape index: {}]   ;;  %s724_s2 = inlined_call_operand.vmem [shape: f32[1,32], index: 2, kind: input, shape index: {}]   ;;  %s725_s3 = inlined_call_operand.vmem [shape: bf16[2,80,32], index: 3, kind: output, shape index: {}]  }
   0x1   :  { %s657_s14 = smov 0  }
   0x2 LB: > { %s25_s15 = sadd.s32 1, %s625_s13  ;;  %p500_p0 = scmp.ge.s32.totalorder %s629_s14, 1  ;;  %s629_s14 = sphi %s657_s14, %s13_s14   ;;  %s625_s13 = sphi %s655_s13, %s727_s13   ;;  %s621_s12 = sphi %s653_s12, %s726_s12  }
   0x3   : > { %p27_p1 = scmp.ge.s32.totalorder %s25_s15, 2  ;;  %p158_p2 = scmp.lt.s32.totalorder %s629_s14, 3 }
   0x5   : > { %s729_s15 = smov (%p27_p1, %s25_s15), 0  ;;  %p159_p3 = pnand %p500_p0, %p158_p2 }
   0x6   : > { %p191_p4 = scmp.lt.s32.totalorder (!%p159_p3), %s621_s12, 1 }
   0x7   : > { %162 = sbr.rel (%p159_p3) target bundleno = 239 (0xef), region = 32 }
   0xc   : > { %v600_v0 = vld [vmem:[%s723_s1 + $0x8] sm:$0xff]   ;;  %v631_v1 = vmov 0.0   ;;  %v601_v2 = vld [vmem:[%s723_s1] sm:$0xff]   ;;  %vm632_vm0 = vmmov 0   ;;  %s731_s12 = smov (!%p191_p4, %s621_s12), 1  ;;  %vm269_vm1 = vcmask 261120  }
   0xd   : > { %545 = vmatprep.subr.bf16.mxu0 %v631_v1  ;;  %569 = vmatprep.subr.bf16.mxu1 %v631_v1  ;;  %s573_s20 = smul.u32 40, %s731_s12  ;;  %v503_v8 = vld [vmem:[%s724_s2] ss:$0 sm:$0xff]  ;;  %vm398_vm2 = vcmask 257024  }
   0xe   : > { %546 = vmatpush3.bf16.msra.mxu0 %v600_v0  ;;  %571 = vmatpush3.bf16.msra.mxu1 %v600_v0 }
   0xf   : > { %547 = vmatprep.subr.bf16.mxu0 %v631_v1  ;;  %570 = vmatprep.subr.bf16.mxu1 %v631_v1  ;;  %s198_s23 = scalar_lea.vmem %s722_s0, %s573_s20  ;;  %s691_s28 = scalar_lea.vmem %s725_s3, %s573_s20 }
  0x10   : > { %549 = vmatprep.mubr.msk.bf16.mxu0 %vm632_vm0, %v631_v1  ;;  %561 = vmatprep.mubr.msk.bf16.mxu1 %vm632_vm0, %v631_v1  ;;  %v602_v3 = vld [vmem:[%s198_s23] sm:$0xff]   ;;  %v603_v4 = vld [vmem:[%s198_s23 + $0x18] sm:$0xff]   ;;  %v604_v5 = vld [vmem:[%s198_s23 + $0x8] sm:$0xff]  }
  0x11   : > { %v605_v6 = vld [vmem:[%s198_s23 + $0x20] sm:$0xff]   ;;  %v606_v7 = vld [vmem:[%s198_s23 + $0x10] sm:$0xff]  }
  0x12   : > { %548 = vmatpush3.bf16.msra.mxu0 %v601_v2  ;;  %572 = vmatpush3.bf16.msra.mxu1 %v601_v2 }
  0x15   : > { %550 = vmatmul.mubr.msk.bf16.vlgmr.msra.gmra.mxu0 %vm269_vm1, %v602_v3  ;;  %562 = vmatmul.mubr.msk.bf16.vlgmr.msra.gmra.mxu1 %vm269_vm1, %v603_v4 }
  0x16   : > { %553 = vmatprep.mubr.msk.bf16.mxu0 %vm632_vm0, %v631_v1  ;;  %565 = vmatprep.mubr.msk.bf16.mxu1 %vm632_vm0, %v631_v1 }
  0x1d   : > { %554 = vmatmul.mubr.msk.bf16.gmra.mxu0 %vm269_vm1, %v604_v5  ;;  %566 = vmatmul.mubr.msk.bf16.gmra.mxu1 %vm269_vm1, %v605_v6 }
  0x1e   : > { %557 = vmatprep.mubr.msk.bf16.mxu0 %vm632_vm0, %v631_v1 }
  0x25   : > { %558 = vmatmul.mubr.msk.bf16.gmra.mxu0 %vm269_vm1, %v606_v7 }
  0xd5   : > { %v319_v9 = vpop.f32.mrf.mxu0  ;;  %v343_v11 = vpop.f32.mrf.mxu1 }
  0xd6   : > { %v320_v10 = vadd.f32 %v503_v8, %v319_v9  ;;  %v344_v13 = vadd.f32 %v503_v8, %v343_v11 }
  0xd7   : > { %v551_v12 = vpop.f32.mrf.mxu0  ;;  %v563_v15 = vpop.f32.mrf.mxu1 }
  0xd8   : > { %v528_v14 = vpack.c.bf16 %v320_v10, %v320_v10  ;;  %v534_v16 = vpack.c.bf16 %v344_v13, %v344_v13 }
  0xd9   : > { %v322_v17 = vpop.f32.mrf.mxu0  ;;  %v346_v19 = vpop.f32.mrf.mxu1 }
  0xda   : > { %399 = vst.msk [vmem:[%s691_s28] sm:$0xf] %vm398_vm2, %v528_v14  ;;  %v323_v18 = vadd.f32 %v503_v8, %v322_v17  ;;  %405 = vst.msk [vmem:[%s691_s28 + $0x18] sm:$0xf] %vm398_vm2, %v534_v16  ;;  %v347_v21 = vadd.f32 %v503_v8, %v346_v19 }
  0xdb   : > { %v552_v20 = vpop.f32.mrf.mxu0  ;;  %v564_v23 = vpop.f32.mrf.mxu1 }
  0xdc   : > { %v529_v22 = vpack.c.bf16 %v323_v18, %v323_v18  ;;  %v535_v24 = vpack.c.bf16 %v347_v21, %v347_v21 }
  0xdd   : > { %v327_v25 = vpop.f32.mrf.mxu0  ;;  %v351_v27 = vpop.f32.mrf.mxu1 }
  0xde   : > { %400 = vst.msk [vmem:[%s691_s28 + $0x4] sm:$0xf] %vm398_vm2, %v529_v22  ;;  %v328_v26 = vadd.f32 %v503_v8, %v327_v25  ;;  %406 = vst.msk [vmem:[%s691_s28 + $0x1c] sm:$0xf] %vm398_vm2, %v535_v24  ;;  %v352_v29 = vadd.f32 %v503_v8, %v351_v27 }
  0xdf   : > { %v555_v28 = vpop.f32.mrf.mxu0  ;;  %v567_v31 = vpop.f32.mrf.mxu1 }
  0xe0   : > { %v530_v30 = vpack.c.bf16 %v328_v26, %v328_v26  ;;  %v536_v32 = vpack.c.bf16 %v352_v29, %v352_v29 }
  0xe1   : > { %v330_v33 = vpop.f32.mrf.mxu0  ;;  %v354_v35 = vpop.f32.mrf.mxu1 }
  0xe2   : > { %401 = vst.msk [vmem:[%s691_s28 + $0x8] sm:$0xf] %vm398_vm2, %v530_v30  ;;  %v331_v34 = vadd.f32 %v503_v8, %v330_v33  ;;  %407 = vst.msk [vmem:[%s691_s28 + $0x20] sm:$0xf] %vm398_vm2, %v536_v32  ;;  %v355_v37 = vadd.f32 %v503_v8, %v354_v35 }
  0xe3   : > { %v556_v36 = vpop.f32.mrf.mxu0  ;;  %v568_v39 = vpop.f32.mrf.mxu1 }
  0xe4   : > { %v531_v38 = vpack.c.bf16 %v331_v34, %v331_v34  ;;  %v537_v40 = vpack.c.bf16 %v355_v37, %v355_v37 }
  0xe5   : > { %v335_v41 = vpop.f32.mrf.mxu0 }
  0xe6   : > { %402 = vst.msk [vmem:[%s691_s28 + $0xc] sm:$0xf] %vm398_vm2, %v531_v38  ;;  %v336_v42 = vadd.f32 %v503_v8, %v335_v41  ;;  %408 = vst.msk [vmem:[%s691_s28 + $0x24] sm:$0xf] %vm398_vm2, %v537_v40 }
  0xe7   : > { %v559_v43 = vpop.f32.mrf.mxu0 }
  0xe8   : > { %v532_v44 = vpack.c.bf16 %v336_v42, %v336_v42 }
  0xe9   : > { %v338_v45 = vpop.f32.mrf.mxu0 }
  0xea   : > { %403 = vst.msk [vmem:[%s691_s28 + $0x10] sm:$0xf] %vm398_vm2, %v532_v44  ;;  %v339_v46 = vadd.f32 %v503_v8, %v338_v45 }
  0xeb   : > { %v560_v47 = vpop.f32.mrf.mxu0 }
  0xec   : > { %v533_v48 = vpack.c.bf16 %v339_v46, %v339_v46 }
  0xee   : > { %404 = vst.msk [vmem:[%s691_s28 + $0x14] sm:$0xf] %vm398_vm2, %v533_v48 }
  0xef PF: > { %s13_s14 = sadd.s32 1, %s629_s14   ;;  %s726_s12 = smov %s625_s13 }
  0xf0   : > { %p10_p5 = scmp.ge.s32.totalorder %s13_s14, 4   ;;  %s727_s13 = smov %s729_s15 }
  0xf2   :  { %12 = sbr.rel (!%p10_p5) target bundleno = 2 (0x2), region = 62 }

</bundles_post_ra>
